<compile_context>
chip_gen: v5e
topology: v5e:2x2
jax: 0.10.0
libtpu: 0.0.40
codegen_flags: <defaults>
</compile_context>

<pallas_src>
import jax
import jax.numpy as jnp
from jax.experimental import pallas as pl
from jax.experimental.pallas import tpu as pltpu

ALPHA = 1.0
GAMMA = 2.0   # fixed at 2 -> squared explicitly in-kernel
LANE = 128    # samples map to the lane axis
SUBL = 8      # sublane tile
CORES = 2     # leading "parallel" grid axis (v7x has 2 TCs; harmless elsewhere)


def _round_up(a, b):
    return ((a + b - 1) // b) * b


def _focal_loss_kernel(x_ref, t_ref, o_ref, acc_ref):
    # x_ref:   (2, BR, 128) f32 logits, class-major
    # t_ref:   (BR, 128)    i32 class ids in {0, 1}
    # o_ref:   (8, 128)     f32 folded partial sums (one block per core-slice)
    # acc_ref: (8, 128)     f32 VMEM accumulator, resident across steps
    step = pl.program_id(1)

    @pl.when(step == 0)
    def _init():
        acc_ref[...] = jnp.zeros_like(acc_ref)

    x0 = x_ref[0]                          # (BR, 128) logits for class 0
    x1 = x_ref[1]                          # (BR, 128) logits for class 1
    t1 = t_ref[...].astype(jnp.float32)    # one-hot for class 1 (== target)
    t0 = 1.0 - t1                          # one-hot for class 0

    def per_class(x, t):
        e = jnp.exp(-jnp.abs(x))                            # single exp
        bce = jnp.maximum(x, 0.0) - x * t + jnp.log1p(e)    # stable BCEWithLogits
        pos = (x > 0.0).astype(jnp.float32)
        # pt = exp(-bce) without a second exp:
        #   exp(-bce) = [1 if t == (x > 0) else e] / (1 + e)
        pt = jnp.where(t == pos, 1.0, e) / (1.0 + e)
        omp = 1.0 - pt
        return (ALPHA * bce) * (omp * omp)                  # gamma == 2 -> square

    loss = per_class(x0, t0) + per_class(x1, t1)            # (BR, 128)

    # Fold (BR, 128) -> (8, 128): layout-preserving split of the sublane-major
    # axis + sum over the leading (non-tiled) axis => pure VPU vreg adds.
    br = loss.shape[0]
    acc_ref[...] += loss.reshape(br // SUBL, SUBL, LANE).sum(axis=0)

    @pl.when(step == pl.num_programs(1) - 1)
    def _finalize():
        o_ref[...] = acc_ref[...]


def focal_loss(inputs, targets, *, block_rows=2048):
    """inputs: (N, 2) float32 logits; targets: (N,) ints in {0,1}.
    Returns the scalar mean focal loss (alpha=1, gamma=2, logits=True, reduce=True)."""
    N, C = inputs.shape
    assert C == 2

    x = inputs.astype(jnp.float32)
    tgt = targets.reshape(-1).astype(jnp.int32)

    # Lane-dense tiling: N samples -> rows of 128 lanes, 8-row sublane tiles.
    rows = pl.cdiv(N, LANE)
    block_rows = _round_up(max(SUBL, block_rows), SUBL)
    block_rows = min(block_rows, _round_up(pl.cdiv(rows, CORES), SUBL))
    rows_pad = _round_up(rows, CORES * block_rows)
    n_pad = rows_pad * LANE
    steps = rows_pad // (CORES * block_rows)

    pad = n_pad - N
    if pad:
        # Padded samples contribute exactly zero focal loss:
        # logits (-100, +100) with target 1  ->  bce == 0, pt == 1.
        x = jnp.concatenate(
            [x, jnp.tile(jnp.array([[-100.0, 100.0]], jnp.float32), (pad, 1))], axis=0)
        tgt = jnp.concatenate([tgt, jnp.ones((pad,), jnp.int32)], axis=0)

    x_cls = x.T.reshape(C, rows_pad, LANE)     # (2, rows_pad, 128)  class-major
    tgt_r = tgt.reshape(rows_pad, LANE)        # (rows_pad, 128)

    partials = pl.pallas_call(
        _focal_loss_kernel,
        out_shape=jax.ShapeDtypeStruct((CORES * SUBL, LANE), jnp.float32),
        grid_spec=pltpu.PrefetchScalarGridSpec(
            num_scalar_prefetch=0,
            grid=(CORES, steps),
            in_specs=[
                pl.BlockSpec((C, block_rows, LANE),
                             lambda c, i: (0, c * steps + i, 0)),
                pl.BlockSpec((block_rows, LANE),
                             lambda c, i: (c * steps + i, 0)),
            ],
            # One tiny (8,128) output block per core-slice, written once on the
            # last step of the "arbitrary" axis from the VMEM accumulator.
            out_specs=pl.BlockSpec((SUBL, LANE), lambda c, i: (c, 0)),
            scratch_shapes=[pltpu.VMEM((SUBL, LANE), jnp.float32)],
        ),
        compiler_params=pltpu.CompilerParams(
            dimension_semantics=("parallel", "arbitrary"),
            vmem_limit_bytes=32 * 1024 * 1024),
    )(x_cls, tgt_r)

    # One tiny reduce of the partial sums (16 x 128 floats) in XLA.
    return jnp.sum(partials) / (N * C)


def focal_loss_ref(inputs, targets):
    t = jnp.eye(2, dtype=jnp.float32)[targets.reshape(-1)]
    x = inputs.astype(jnp.float32)
    bce = jnp.maximum(x, 0.0) - x * t + jnp.log1p(jnp.exp(-jnp.abs(x)))
    pt = jnp.exp(-bce)
    return jnp.mean(ALPHA * (1.0 - pt) ** GAMMA * bce)


if __name__ == "__main__":
    key = jax.random.PRNGKey(0)
    k1, k2, k3, k4 = jax.random.split(key, 4)

    # Small, non-multiple-of-128 batch: exercises the zero-loss padding path
    # (single grid step per core-slice: init + finalize in one invocation).
    n1 = 300
    x1 = jax.random.normal(k1, (n1, 2), dtype=jnp.float32)
    t1 = jax.random.randint(k2, (n1,), 0, 2, dtype=jnp.int32)
    out1 = jax.block_until_ready(focal_loss(x1, t1))
    ref1 = focal_loss_ref(x1, t1)
    assert jnp.allclose(out1, ref1, rtol=1e-4, atol=1e-6), (out1, ref1)

    # Larger batch with a tiny block size: exercises multi-step accumulation
    # into the VMEM scratch across the "arbitrary" axis on both core-slices.
    n2 = 8192
    x2 = 2.0 * jax.random.normal(k3, (n2, 2), dtype=jnp.float32)
    t2 = jax.random.randint(k4, (n2,), 0, 2, dtype=jnp.int32)
    out2 = jax.block_until_ready(focal_loss(x2, t2, block_rows=8))
    ref2 = focal_loss_ref(x2, t2)
    assert jnp.allclose(out2, ref2, rtol=1e-4, atol=1e-6), (out2, ref2)

    # Default (large) block size path.
    out3 = jax.block_until_ready(focal_loss(x2, t2))
    assert jnp.allclose(out3, ref2, rtol=1e-4, atol=1e-6), (out3, ref2)

    print("KERNEL_OK")
</pallas_src>

<mosaic_0001>
module attributes {stable_mosaic.version = 11 : i64} {
  func.func @_focal_loss_kernel(%arg0: i32, %arg1: i32, %arg2: memref<2x8x128xf32, #tpu.memory_space<vmem>>, %arg3: memref<8x128xi32, #tpu.memory_space<vmem>>, %arg4: memref<8x128xf32, #tpu.memory_space<vmem>>, %arg5: memref<8x128xf32, #tpu.memory_space<vmem>>) attributes {dimension_semantics = [#tpu.dimension_semantics<parallel>, #tpu.dimension_semantics<arbitrary>], iteration_bounds = array<i64: 2, 1>, scalar_prefetch = 0 : i64, scratch_operands = 1 : i64, tpu.core_type = #tpu.core_type<tc>, window_params = [{transform_indices = @transform_0, window_bounds = array<i64: 2, 8, 128>}, {transform_indices = @transform_1, window_bounds = array<i64: 8, 128>}, {transform_indices = @transform_2, window_bounds = array<i64: 8, 128>}]} {
    %c0_i32 = arith.constant 0 : i32
    %0 = arith.cmpi eq, %arg1, %c0_i32 : i32
    %1 = arith.extui %0 : i1 to i32
    %c0_i32_0 = arith.constant 0 : i32
    %2 = arith.cmpi ne, %1, %c0_i32_0 : i32
    scf.if %2 {
      %cst_28 = arith.constant 0.000000e+00 : f32
      %72 = vector.broadcast %cst_28 : f32 to vector<8x128xf32>
      %c0_29 = arith.constant 0 : index
      %c0_30 = arith.constant 0 : index
      %73 = vector.load %arg5[%c0_29, %c0_30] : memref<8x128xf32, #tpu.memory_space<vmem>>, vector<8x128xf32>
      tpu.vector_store %arg5[%c0_29, %c0_30], %72 {strides = array<i32>} : memref<8x128xf32, #tpu.memory_space<vmem>>, vector<8x128xf32>,
    } else {
    }
    %c0 = arith.constant 0 : index
    %c0_1 = arith.constant 0 : index
    %c0_2 = arith.constant 0 : index
    %3 = vector.load %arg2[%c0, %c0_1, %c0_2] : memref<2x8x128xf32, #tpu.memory_space<vmem>>, vector<1x8x128xf32>
    %4 = vector.shape_cast %3 : vector<1x8x128xf32> to vector<8x128xf32>
    %c1 = arith.constant 1 : index
    %c0_3 = arith.constant 0 : index
    %c0_4 = arith.constant 0 : index
    %5 = vector.load %arg2[%c1, %c0_3, %c0_4] : memref<2x8x128xf32, #tpu.memory_space<vmem>>, vector<1x8x128xf32>
    %6 = vector.shape_cast %5 : vector<1x8x128xf32> to vector<8x128xf32>
    %c0_5 = arith.constant 0 : index
    %c0_6 = arith.constant 0 : index
    %7 = vector.load %arg3[%c0_5, %c0_6] : memref<8x128xi32, #tpu.memory_space<vmem>>, vector<8x128xi32>
    %8 = arith.sitofp %7 : vector<8x128xi32> to vector<8x128xf32>
    %cst = arith.constant 1.000000e+00 : f32
    %9 = vector.broadcast %cst : f32 to vector<8x128xf32>
    %10 = arith.subf %9, %8 : vector<8x128xf32>
    %11 = math.absf %4 : vector<8x128xf32>
    %cst_7 = arith.constant 0.000000e+00 : f32
    %12 = vector.broadcast %cst_7 : f32 to vector<8x128xf32>
    %13 = arith.subf %12, %11 : vector<8x128xf32>
    %14 = math.exp %13 : vector<8x128xf32>
    %cst_8 = arith.constant 0.000000e+00 : f32
    %15 = vector.broadcast %cst_8 : f32 to vector<8x128xf32>
    %16 = arith.maximumf %4, %15 : vector<8x128xf32>
    %17 = arith.mulf %4, %10 : vector<8x128xf32>
    %18 = arith.subf %16, %17 : vector<8x128xf32>
    %19 = math.log1p %14 : vector<8x128xf32>
    %20 = arith.addf %18, %19 : vector<8x128xf32>
    %cst_9 = arith.constant 0.000000e+00 : f32
    %21 = vector.broadcast %cst_9 : f32 to vector<8x128xf32>
    %22 = arith.cmpf ogt, %4, %21 : vector<8x128xf32>
    %23 = arith.extui %22 : vector<8x128xi1> to vector<8x128xi32>
    %24 = arith.sitofp %23 : vector<8x128xi32> to vector<8x128xf32>
    %25 = arith.cmpf oeq, %10, %24 : vector<8x128xf32>
    %cst_10 = arith.constant 1.000000e+00 : f32
    %26 = vector.broadcast %cst_10 : f32 to vector<8x128xf32>
    %27 = arith.select %25, %26, %14 : vector<8x128xi1>, vector<8x128xf32>
    %cst_11 = arith.constant 1.000000e+00 : f32
    %28 = vector.broadcast %cst_11 : f32 to vector<8x128xf32>
    %29 = arith.addf %28, %14 : vector<8x128xf32>
    %30 = arith.divf %27, %29 : vector<8x128xf32>
    %cst_12 = arith.constant 1.000000e+00 : f32
    %31 = vector.broadcast %cst_12 : f32 to vector<8x128xf32>
    %32 = arith.subf %31, %30 : vector<8x128xf32>
    %cst_13 = arith.constant 1.000000e+00 : f32
    %33 = vector.broadcast %cst_13 : f32 to vector<8x128xf32>
    %34 = arith.mulf %33, %20 : vector<8x128xf32>
    %35 = arith.mulf %32, %32 : vector<8x128xf32>
    %36 = arith.mulf %34, %35 : vector<8x128xf32>
    %37 = math.absf %6 : vector<8x128xf32>
    %cst_14 = arith.constant 0.000000e+00 : f32
    %38 = vector.broadcast %cst_14 : f32 to vector<8x128xf32>
    %39 = arith.subf %38, %37 : vector<8x128xf32>
    %40 = math.exp %39 : vector<8x128xf32>
    %cst_15 = arith.constant 0.000000e+00 : f32
    %41 = vector.broadcast %cst_15 : f32 to vector<8x128xf32>
    %42 = arith.maximumf %6, %41 : vector<8x128xf32>
    %43 = arith.mulf %6, %8 : vector<8x128xf32>
    %44 = arith.subf %42, %43 : vector<8x128xf32>
    %45 = math.log1p %40 : vector<8x128xf32>
    %46 = arith.addf %44, %45 : vector<8x128xf32>
    %cst_16 = arith.constant 0.000000e+00 : f32
    %47 = vector.broadcast %cst_16 : f32 to vector<8x128xf32>
    %48 = arith.cmpf ogt, %6, %47 : vector<8x128xf32>
    %49 = arith.extui %48 : vector<8x128xi1> to vector<8x128xi32>
    %50 = arith.sitofp %49 : vector<8x128xi32> to vector<8x128xf32>
    %51 = arith.cmpf oeq, %8, %50 : vector<8x128xf32>
    %cst_17 = arith.constant 1.000000e+00 : f32
    %52 = vector.broadcast %cst_17 : f32 to vector<8x128xf32>
    %53 = arith.select %51, %52, %40 : vector<8x128xi1>, vector<8x128xf32>
    %cst_18 = arith.constant 1.000000e+00 : f32
    %54 = vector.broadcast %cst_18 : f32 to vector<8x128xf32>
    %55 = arith.addf %54, %40 : vector<8x128xf32>
    %56 = arith.divf %53, %55 : vector<8x128xf32>
    %cst_19 = arith.constant 1.000000e+00 : f32
    %57 = vector.broadcast %cst_19 : f32 to vector<8x128xf32>
    %58 = arith.subf %57, %56 : vector<8x128xf32>
    %cst_20 = arith.constant 1.000000e+00 : f32
    %59 = vector.broadcast %cst_20 : f32 to vector<8x128xf32>
    %60 = arith.mulf %59, %46 : vector<8x128xf32>
    %61 = arith.mulf %58, %58 : vector<8x128xf32>
    %62 = arith.mulf %60, %61 : vector<8x128xf32>
    %63 = arith.addf %36, %62 : vector<8x128xf32>
    %c0_21 = arith.constant 0 : index
    %c0_22 = arith.constant 0 : index
    %64 = vector.load %arg5[%c0_21, %c0_22] : memref<8x128xf32, #tpu.memory_space<vmem>>, vector<8x128xf32>
    %65 = vector.shape_cast %63 : vector<8x128xf32> to vector<1x8x128xf32>
    %cst_23 = arith.constant dense<0.000000e+00> : vector<8x128xf32>
    %66 = vector.multi_reduction <add>, %65, %cst_23 [0] : vector<1x8x128xf32> to vector<8x128xf32>
    %67 = arith.addf %64, %66 : vector<8x128xf32>
    %c0_24 = arith.constant 0 : index
    %c0_25 = arith.constant 0 : index
    %68 = vector.load %arg5[%c0_24, %c0_25] : memref<8x128xf32, #tpu.memory_space<vmem>>, vector<8x128xf32>
    tpu.vector_store %arg5[%c0_24, %c0_25], %67 {strides = array<i32>} : memref<8x128xf32, #tpu.memory_space<vmem>>, vector<8x128xf32>,
    %c0_i32_26 = arith.constant 0 : i32
    %69 = arith.cmpi eq, %arg1, %c0_i32_26 : i32
    %70 = arith.extui %69 : i1 to i32
    %c0_i32_27 = arith.constant 0 : i32
    %71 = arith.cmpi ne, %70, %c0_i32_27 : i32
    scf.if %71 {
      %c0_28 = arith.constant 0 : index
      %c0_29 = arith.constant 0 : index
      %72 = vector.load %arg5[%c0_28, %c0_29] : memref<8x128xf32, #tpu.memory_space<vmem>>, vector<8x128xf32>
      %c0_30 = arith.constant 0 : index
      %c0_31 = arith.constant 0 : index
      %73 = vector.load %arg4[%c0_30, %c0_31] : memref<8x128xf32, #tpu.memory_space<vmem>>, vector<8x128xf32>
      tpu.vector_store %arg4[%c0_30, %c0_31], %72 {strides = array<i32>} : memref<8x128xf32, #tpu.memory_space<vmem>>, vector<8x128xf32>,
    } else {
    }
    return
  }
  func.func @transform_0(%arg0: i32, %arg1: i32) -> (i32, i32, i32) {
    %c1_i32 = arith.constant 1 : i32
    %0 = arith.muli %arg0, %c1_i32 : i32
    %1 = arith.addi %0, %arg1 : i32
    %c0_i32 = arith.constant 0 : i32
    %c0_i32_0 = arith.constant 0 : i32
    %c0_i32_1 = arith.constant 0 : i32
    return %c0_i32, %1, %c0_i32_0 : i32, i32, i32
  }
  func.func @transform_1(%arg0: i32, %arg1: i32) -> (i32, i32) {
    %c1_i32 = arith.constant 1 : i32
    %0 = arith.muli %arg0, %c1_i32 : i32
    %1 = arith.addi %0, %arg1 : i32
    %c0_i32 = arith.constant 0 : i32
    %c0_i32_0 = arith.constant 0 : i32
    return %1, %c0_i32 : i32, i32
  }
  func.func @transform_2(%arg0: i32, %arg1: i32) -> (i32, i32) {
    %c0_i32 = arith.constant 0 : i32
    %c0_i32_0 = arith.constant 0 : i32
    return %arg0, %c0_i32 : i32, i32
  }
}

</mosaic_0001>

<bundles_post_ra>
// kernel: tpu_custom_call.1
= control target key start
LH: loop header
LB: loop body
LE: loop exit
PB: predicated region body
PF: predicated region fallthrough
CT: control target
= control target key end

     0   :  { %7 = vsyncpa [#allocation4], 0  ;;  %s902_s0 = inlined_call_operand.hbm [shape: f32[2,16,128], index: 0, kind: input, shape index: {}]   ;;  %s903_s1 = inlined_call_operand.hbm [shape: s32[16,128], index: 1, kind: input, shape index: {}]   ;;  %s904_s2 = inlined_call_operand.hbm [shape: f32[16,128], index: 2, kind: output, shape index: {}]  }
   0x1   :  { %9 = vsyncpa [#allocation4 + $0x1], 0 }
   0x2   :  { %10 = vsyncpa [#allocation7], 0 }
   0x3   :  { %12 = vsyncpa [#allocation7 + $0x1], 0 }
   0x4   :  { %13 = vsyncpa [#allocation5], 0 }
   0x5   :  { %15 = vsyncpa [#allocation5 + $0x1], 0  ;;  %s713_s9 = smov 0   ;;  %s715_s10 = smov 0  }
   0x6   :  { %s717_s11 = smov 0   ;;  %s719_s12 = smov 0  }
   0x7   :  { %s721_s13 = smov 0   ;;  %s723_s14 = smov 0  }
   0x8 LB: > { %s444_s15 = sadd.s32 4294967295, %s692_s14   ;;  %s445_s16 = sadd.s32 4294967294, %s692_s14   ;;  %s692_s14 = sphi %s723_s14, %s21_s14   ;;  %s688_s13 = sphi %s721_s13, %s922_s13   ;;  %s684_s12 = sphi %s719_s12, %s921_s12   ;;  %s680_s11 = sphi %s717_s11, %s920_s11   ;;  %s676_s10 = sphi %s715_s10, %s919_s10   ;;  %s672_s9 = sphi %s713_s9, %s918_s9  }
   0x9   : > { %s33_s17 = sadd.s32 1, %s688_s13  ;;  %s42_s18 = sadd.s32 1, %s680_s11 }
   0xa   : > { %p35_p0 = scmp.ge.s32.totalorder %s33_s17, 2  ;;  %p49_p1 = scmp.ne.s32.totalorder %s680_s11, %s676_s10 }
   0xb   : > { %p50_p2 = scmp.eq.s32.totalorder %s692_s14, 0  ;;  %p55_p3 = scmp.ne.s32.totalorder %s676_s10, %s672_s9 }
   0xc   : > { %s924_s17 = smov (%p35_p0, %s33_s17), 0  ;;  %p56_p5 = scmp.eq.s32.totalorder %s444_s15, 0 }
   0xd   : > { %p754_p4 = por %p50_p2, %p49_p1  ;;  %s39_s20 = ssub.s32 %s688_s13, %s924_s17 }
   0xe   : > { %p107_p6 = scmp.eq.s32.totalorder %s444_s15, 1  ;;  %p40_p7 = scmp.eq.s32.totalorder %s39_s20, 0 }
   0xf   : > { %p760_p8 = por %p56_p5, %p55_p3  ;;  %p113_p10 = scmp.eq.s32.totalorder %s445_s16, 1 }
  0x10   : > { %p764_p9 = por %p107_p6, %p49_p1  ;;  %p447_p12 = scmp.ge.s32.totalorder %s692_s14, 2 }
  0x11   : > { %s769_s23 = scalar_select %p40_p7, %s680_s11, %s42_s18  }
  0x12   : > { %p771_p11 = por %p113_p10, %p55_p3  ;;  %p480_p13 = scmp.lt.s32.totalorder %s692_s14, 2 }
  0x13   : > { %s133_s25 = sand.u32 1, %s680_s11   ;;  %s449_s27 = sshll.u32 %s688_s13, 3 }
  0x14   : > { %s448_s26 = sshll.u32 %s133_s25, 4  ;;  %s142_s30 = scalar_lea.hbm %s902_s0, %s449_s27 }
  0x15   : > { %s137_s3 = scalar_lea.vmem [#allocation3], %s448_s26  ;;  %s143_s5 = sshll.u32 %s142_s30, 4  ;;  %s144_s5 = int_to_ptr.hbm [resolvable:$true] %s143_s5 }
  0x16   : > { %s145_s4 = sshll.u32 %s137_s3, 4  ;;  %p784_p0 = pnand %p480_p13, %p754_p4  ;;  %s146_s4 = int_to_ptr.vmem [resolvable:$true] %s145_s4 }
  0x17   : > { %s134_s7 = scalar_lea.sflag [#allocation4], %s133_s25  ;;  %s694_s8 = smov 256  }
  0x18   : > { %s695_s15 = smov 128   ;;  %s696_s16 = smov 8  }
  0x19   : > { %472 = dma.hbm_to_vmem [thread:$0]  (!%p784_p0), %s144_s5, 256, %s146_s4, %s134_s7, %s694_s8, %s695_s15, %s696_s16  }
  0x1a   : > { %p452_p1 = scmp.ge.s32.totalorder %s692_s14, 1  ;;  %p173_p2 = scmp.lt.s32.totalorder %s692_s14, 3 }
  0x1b   : > { %s450_s18 = sshll.u32 %s133_s25, 3  ;;  %s164_s19 = scalar_lea.hbm %s903_s1, %s449_s27 }
  0x1c   : > { %p174_p3 = pnand %p452_p1, %p173_p2  ;;  %s159_s28 = scalar_lea.vmem [#allocation6], %s450_s18 }
  0x1d   : > { %s168_s29 = sshll.u32 %s159_s28, 4  ;;  %s166_s30 = sshll.u32 %s164_s19, 4  ;;  %s169_s29 = int_to_ptr.vmem [resolvable:$true] %s168_s29  ;;  %s167_s30 = int_to_ptr.hbm [resolvable:$true] %s166_s30 }
  0x1e   : > { %s156_s3 = scalar_lea.sflag [#allocation7], %s133_s25  ;;  %177 = sbr.rel (%p174_p3) target bundleno = 86 (0x56), region = 28 }
  0x1f   : > { %475 = dma.hbm_to_vmem [thread:$0]  (!%p784_p0), %s167_s30, 128, %s169_s29, %s156_s3  }
  0x20   : > { %s798_s4 = sand.u32 (!%p174_p3), 1, %s676_s10  }
  0x21   : > { %s453_s5 = sshll.u32 (!%p174_p3), %s798_s4, 4  ;;  %s180_s7 = scalar_lea.sflag (!%p174_p3), [#allocation4], %s798_s4 }
  0x22   : > { %s183_s8 = scalar_lea.vmem (!%p174_p3), [#allocation3], %s453_s5 }
  0x23   : > { %659 = dma.done.wait (%p760_p8), %s180_s7, 256  }
  0x24   : > { %661 = vsyncadd (%p760_p8), %s180_s7, 4294967040  ;;  %s454_s25 = sshll.u32 %s798_s4, 3  ;;  %s190_s27 = scalar_lea.sflag [#allocation7], %s798_s4 }
  0x25   : > { %s193_s6 = scalar_lea.vmem [#allocation6], %s454_s25 }
  0x26   : > { %663 = dma.done.wait (%p760_p8), %s190_s27, 128  }
  0x27   : > { %665 = vsyncadd (%p760_p8), %s190_s27, 4294967168  ;;  %v227_v0 = vld [vmem:[%s183_s8] sm:$0xff]  ;;  %v814_v1 = vld [vmem:[%s183_s8 + $0x8] sm:$0xff]  ;;  %v697_v16 = vmov 0.0   ;;  %s460_s21 = sshll.u32 %s684_s12, 3  ;;  %s219_s20 = scalar_lea.vmem [#allocation8], %s454_s25 }
  0x28   : > { %v233_v2 = vand.u32 2147483647, %v227_v0  ;;  %v274_v3 = vand.u32 2147483647, %v814_v1  ;;  %v230_v9 = vld [vmem:[%s193_s6] sm:$0xff]  ;;  %vm250_vm0 = vcmp.gt.f32.partialorder %v227_v0, 0.0  ;;  %s336_s18 = scalar_lea.hbm %s904_s2, %s460_s21 }
  0x29   : > { %v231_v13 = vcvt.s32.f32 %v230_v9  ;;  %vm291_vm1 = vcmp.gt.f32.partialorder %v814_v1, 0.0  ;;  %v457_v17 = vsel %vm250_vm0, 1.0, %v697_v16  ;;  %v237_v20 = vmax.f32 %v227_v0, 0.0  ;;  %s338_s26 = sshll.u32 %s219_s20, 4  ;;  %s340_s19 = sshll.u32 %s336_s18, 4  ;;  %s339_s26 = int_to_ptr.vmem [resolvable:$true] %s338_s26  ;;  %s341_s19 = int_to_ptr.hbm [resolvable:$true] %s340_s19 }
  0x2a   : > { %v234_v4 = vsub.f32 0.0, %v233_v2  ;;  %v275_v5 = vsub.f32 0.0, %v274_v3  ;;  %v458_v18 = vsel %vm291_vm1, 1.0, %v697_v16  ;;  %v278_v21 = vmax.f32 %v814_v1, 0.0  ;;  %s326_s12 = scalar_lea.sflag [#allocation5], %s798_s4  ;;  %s620_s28 = sshra.s32 %s341_s19, 4  ;;  %s621_s28 = int_to_ptr.hbm [resolvable:$true] %s620_s28 }
  0x2b   : > { %v232_v14 = vsub.f32 1.0, %v231_v13  ;;  %v279_v22 = vmul.f32 %v814_v1, %v231_v13  ;;  %vm294_vm3 = vcmp.eq.f32.partialorder %v231_v13, %v458_v18  ;;  %s622_s29 = scalar_lea.hbm %s621_s28, 8  ;;  %s626_s5 = scalar_lea.hbm %s904_s2, 16 }
  0x2c   : > { %v235_v6 = vmul.f32 1.442695, %v234_v4  ;;  %v276_v7 = vmul.f32 1.442695, %v275_v5  ;;  %p623_p4 = scmp.ne.s32.totalorder %s621_s28, %s622_s29  ;;  %p627_p7 = scmp.lt.s32.totalorder %s621_s28, %s904_s2 }
  0x2d   : > { %v238_v24 = vmul.f32 %v232_v14, %v227_v0  ;;  %vm828_vm2 = vcmp.eq.f32.partialorder %v232_v14, %v457_v17  ;;  %v280_v61 = vsub.f32 %v278_v21, %v279_v22  ;;  %p628_p8 = scmp.lt.s32.totalorder %s626_s5, %s622_s29 }
  0x2e   : > { %534 = vpow2.f32 %v235_v6  ;;  %p624_p5 = pnand %p623_p4, %p764_p9 }
  0x2f   : > { %536 = vpow2.f32 %v276_v7  ;;  %v239_v42 = vsub.f32 %v237_v20, %v238_v24  ;;  %p629_p10 = por %p628_p8, %p627_p7 }
  0x30   : > { %p625_p6 = pneg %p624_p5 }
  0x32   : > { %p630_p13 = pnand %p629_p10, %p625_p6 }
  0x34   : > { %v817_v8 = vpop.eup %534 }
  0x35   : > { %v819_v10 = vpop.eup %536  ;;  %v240_v11 = vadd.f32 1.0, %v817_v8  ;;  %v243_v15 = vmul.f32 -0.5, %v817_v8  ;;  %v246_v29 = vand.u32 2147483647, %v817_v8  ;;  %v254_v50 = vsel %vm828_vm2, 1.0, %v817_v8 }
  0x36   : > { %v281_v12 = vadd.f32 1.0, %v819_v10  ;;  %v284_v23 = vmul.f32 -0.5, %v819_v10  ;;  %v287_v36 = vand.u32 2147483647, %v819_v10  ;;  %v295_v59 = vsel %vm294_vm3, 1.0, %v819_v10 }
  0x37   : > { %538 = vrcp.f32 %v240_v11  ;;  %v244_v28 = vadd.f32 1.0, %v243_v15  ;;  %vm261_vm4 = vweird.f32 %v240_v11  ;;  %v267_v30 = vand.u32 2147483648, %v240_v11 }
  0x38   : > { %540 = vrcp.f32 %v281_v12  ;;  %v265_v33 = vand.u32 2147483647, %v240_v11  ;;  %v285_v35 = vadd.f32 1.0, %v284_v23  ;;  %vm302_vm6 = vweird.f32 %v281_v12 }
  0x39   : > { %542 = vlog2.f32 %v240_v11  ;;  %v308_v37 = vand.u32 2147483648, %v281_v12  ;;  %v306_v41 = vand.u32 2147483647, %v281_v12  ;;  %v245_v44 = vmul.f32 %v817_v8, %v244_v28 }
  0x3a   : > { %544 = vlog2.f32 %v281_v12  ;;  %v268_v46 = vor.u32 1.1754944e-38, %v267_v30  ;;  %vm841_vm9 = vcmp.lt.f32.partialorder %v246_v29, 0.0004427343  ;;  %vm266_vm10 = vcmp.eq.f32.partialorder %v265_v33, 8.507059e+37 }
  0x3b   : > { %v286_v52 = vmul.f32 %v819_v10, %v285_v35  ;;  %v309_v53 = vor.u32 1.1754944e-38, %v308_v37  ;;  %vm852_vm12 = vcmp.lt.f32.partialorder %v287_v36, 0.0004427343  ;;  %vm307_vm13 = vcmp.eq.f32.partialorder %v306_v41, 8.507059e+37 }
  0x3d   : > { %v539_v19 = vpop.eup %538 }
  0x3e   : > { %v257_v26 = vmul.f32 %v539_v19, %v240_v11  ;;  %v541_v27 = vpop.eup %540  ;;  %vm262_vm5 = vweird.f32 %v539_v19 }
  0x3f   : > { %v543_v31 = vpop.eup %542  ;;  %v298_v34 = vmul.f32 %v541_v27, %v281_v12  ;;  %vm303_vm7 = vweird.f32 %v541_v27  ;;  %vm837_vm8 = vmor %vm261_vm4, %vm262_vm5 }
  0x40   : > { %v258_v32 = vsub.f32 1.0, %v257_v26  ;;  %v545_v38 = vpop.eup %544  ;;  %v242_v43 = vmul.f32 0.6931472, %v543_v31  ;;  %vm304_vm11 = vmor %vm302_vm6, %vm303_vm7 }
  0x41   : > { %v299_v40 = vsub.f32 1.0, %v298_v34  ;;  %v283_v51 = vmul.f32 0.6931472, %v545_v38 }
  0x42   : > { %v259_v39 = vmul.f32 %v539_v19, %v258_v32  ;;  %v248_v57 = vsel %vm841_vm9, %v245_v44, %v242_v43 }
  0x43   : > { %v300_v49 = vmul.f32 %v541_v27, %v299_v40  ;;  %v289_v63 = vsel %vm852_vm12, %v286_v52, %v283_v51  ;;  %v249_v1 = vadd.f32 %v248_v57, %v239_v42 }
  0x44   : > { %v260_v48 = vadd.f32 %v539_v19, %v259_v39  ;;  %v290_v5 = vadd.f32 %v289_v63, %v280_v61 }
  0x45   : > { %v301_v56 = vadd.f32 %v541_v27, %v300_v49 }
  0x46   : > { %v264_v54 = vsel %vm837_vm8, %v539_v19, %v260_v48 }
  0x47   : > { %v269_v58 = vsel %vm266_vm10, %v268_v46, %v264_v54  ;;  %v305_v62 = vsel %vm304_vm11, %v541_v27, %v301_v56 }
  0x48   : > { %v270_v60 = vmul.f32 %v269_v58, %v254_v50  ;;  %v310_v0 = vsel %vm307_vm13, %v309_v53, %v305_v62 }
  0x49   : > { %v311_v3 = vmul.f32 %v310_v0, %v295_v59 }
  0x4a   : > { %v271_v2 = vsub.f32 1.0, %v270_v60 }
  0x4b   : > { %v312_v6 = vsub.f32 1.0, %v311_v3 }
  0x4c   : > { %v272_v4 = vmul.f32 %v271_v2, %v271_v2 }
  0x4d   : > { %v313_v8 = vmul.f32 %v312_v6, %v312_v6 }
  0x4e   : > { %v273_v7 = vmul.f32 %v272_v4, %v249_v1 }
  0x4f   : > { %v314_v9 = vmul.f32 %v313_v8, %v290_v5 }
  0x51   : > { %v315_v10 = vadd.f32 %v314_v9, %v273_v7 }
  0x53   : > { %324 = vst [vmem:[%s219_s20] sm:$0xff] %v315_v10 }
  0x54   : > { %633 = shalt.err (!%p630_p13)
}
  0x55   : > { %467 = dma.vmem_to_hbm [thread:$0]  (%p764_p9), %s339_s26, 128, %s341_s19, %s326_s12  }
  0x56 PF: > { %s352_s4 = sand.u32 1, %s672_s9   ;;  %p477_p0 = pnand %p447_p12, %p771_p11 }
  0x57   : > { %s353_s25 = scalar_lea.sflag [#allocation5], %s352_s4 }
  0x58   : > { %p478_p1 = pneg %p477_p0 }
  0x5a   : > { %667 = dma.done.wait (%p478_p1), %s353_s25, 128  }
  0x5b   : > { %669 = vsyncadd (%p478_p1), %s353_s25, 4294967168  ;;  %s21_s14 = sadd.s32 1, %s692_s14   ;;  %s918_s9 = smov %s676_s10 }
  0x5c   : > { %p18_p2 = scmp.ge.s32.totalorder %s21_s14, 4   ;;  %s919_s10 = smov %s680_s11 }
  0x5d   : > { %s920_s11 = smov %s769_s23  ;;  %s921_s12 = smov %s688_s13 }
  0x5e   : > { %s922_s13 = smov %s924_s17  ;;  %20 = sbr.rel (!%p18_p2) target bundleno = 8 (0x8), region = 95 }
  0x63   :  { %359 = vsyncpa [#allocation4], 1 }
  0x64   :  { %361 = vsyncpa [#allocation4 + $0x1], 1 }
  0x65   :  { %362 = vsyncpa [#allocation7], 1 }
  0x66   :  { %364 = vsyncpa [#allocation7 + $0x1], 1 }
  0x67   :  { %365 = vsyncpa [#allocation5], 1 }
  0x68   :  { %367 = vsyncpa [#allocation5 + $0x1], 1 }

</bundles_post_ra>
